<compile_context>
chip_gen: v6e
topology: v6e:2x2x1
jax: 0.10.0
libtpu: 0.0.40
codegen_flags: <defaults>
</compile_context>

<pallas_src>
import jax
import jax.numpy as jnp
from jax.experimental import pallas as pl
from jax.experimental.pallas import tpu as pltpu


_SCALE = {"both": (2, 2), "temporal": (1, 2), "spatial": (2, 1)}


def _upsample_conv_kernel(x_ref, e_ref, p_ref, b_ref, o_ref):
    """One (batch, row-tile) grid step.

    x_ref : (1, S, C_in*T)           original image, channels packed on lanes   [VMEM]
    e_ref : (K, C_in*T, C_out*Wout)  weight-folded column operators             [VMEM]
    p_ref : (TR, K*S)                0/1 row operator rows for this tile        [VMEM]
    b_ref : (1, C_out*Wout)          bias broadcast over Wout                   [VMEM]
    o_ref : (1, C_out, TR, Wout)     output row tile                            [VMEM]
    """
    k = e_ref.shape[0]
    c_out, w_out = o_ref.shape[1], o_ref.shape[3]

    x_mat = x_ref[0, :, :]                                          # (S, C_in*T)

    # Column stage: upsample + zero-pad + kw taps + weight fold, all baked into Ehat.
    m_parts = [
        jnp.dot(x_mat, e_ref[kh, :, :], preferred_element_type=jnp.float32)
        for kh in range(k)
    ]                                                               # each (S, C_out*Wout)
    m_full = jnp.concatenate(m_parts, axis=0)                       # (K*S, C_out*Wout)

    # Row stage: one lane-dense MXU dot per row tile (all output channels packed on lanes).
    out_packed = jnp.dot(p_ref[...], m_full, preferred_element_type=jnp.float32)
    out_packed = out_packed + b_ref[...]                            # (TR, C_out*Wout)

    for co in range(c_out):
        o_ref[0, co, :, :] = out_packed[:, co * w_out:(co + 1) * w_out].astype(o_ref.dtype)


def _vmem_limit_bytes():
    """Per-generation VMEM limit: ~half of physical, capped at 64 MiB (v7x has 64 MiB/TC)."""
    try:
        cap = pltpu.get_tpu_info().vmem_capacity_bytes
    except Exception:
        cap = 64 * 1024 * 1024
    return int(min(max(cap // 2, 16 * 1024 * 1024), 64 * 1024 * 1024))


def _choose_row_tile(h_out, c_out, w_out, vmem_limit):
    """Largest multiple-of-8 divisor of h_out whose output block fits a slice of the budget."""
    if h_out % 8 != 0:
        return h_out
    bytes_per_row = max(c_out * w_out * 4, 1)
    # Keep the (double-buffered) output block to ~1/8 of the VMEM budget.
    max_rows = max(8, (vmem_limit // 8) // bytes_per_row)
    max_rows = min(max_rows, h_out)
    cands = [d for d in range(8, h_out + 1, 8) if h_out % d == 0 and d <= max_rows]
    return max(cands) if cands else h_out


def upsample2d_forward(x_nchw, weight_oikk, bias, *, up_dim="both",
                       conv_kernel_size=3, with_conv=True):
    """Pallas-backed forward of Upsample2D.

    x_nchw:      (N, C, S, T) float32
    weight_oikk: (C, C, K, K)  (PyTorch Conv2d layout: C_out, C_in, KH, KW)
    bias:        (C,)
    """
    assert conv_kernel_size in (3, 5)
    assert up_dim in _SCALE
    sr, sc = _SCALE[up_dim]
    n, c, s, t = x_nchw.shape

    if not with_conv:
        x = jnp.repeat(x_nchw, sr, axis=2) if sr > 1 else x_nchw
        x = jnp.repeat(x, sc, axis=3) if sc > 1 else x
        return x

    k = conv_kernel_size
    pad = (k - 1) // 2
    h_out, w_out = sr * s, sc * t
    c_out = c

    # --- host-side operator construction (tiny) -------------------------------------
    # Column operators (nearest col-upsample + zero col-pad + kw tap):
    #   E_kw[b, j] = 1 iff 0 <= j+kw-pad < Wout and b == (j+kw-pad)//sc
    kw_idx = jnp.arange(k)[:, None, None]
    b_idx = jnp.arange(t)[None, :, None]
    j_idx = jnp.arange(w_out)[None, None, :]
    col = j_idx + kw_idx - pad
    e_all = ((col >= 0) & (col < w_out) & (b_idx == col // sc)).astype(jnp.float32)  # (K,T,W)

    # Pre-fold conv weights into the column operators:
    #   Ehat[kh, ci*T+b, co*W+j] = sum_kw W[co,ci,kh,kw] * E_kw[b,j]
    w_f32 = jnp.asarray(weight_oikk, jnp.float32)                    # (C_out, C_in, K, K)
    ehat = jnp.einsum("oihk,kbj->hiboj", w_f32, e_all)               # (K, C_in, T, C_out, W)
    ehat = ehat.reshape(k, c * t, c_out * w_out)

    # Row operator (nearest row-upsample + zero row-pad + kh tap), taps stacked on contraction:
    #   P[i, kh*S + a] = 1 iff 0 <= i+kh-pad < Hout and a == (i+kh-pad)//sr
    kh_idx = jnp.arange(k)[:, None, None]
    i_idx = jnp.arange(h_out)[None, :, None]
    a_idx = jnp.arange(s)[None, None, :]
    row = i_idx + kh_idx - pad
    p_all = ((row >= 0) & (row < h_out) & (a_idx == row // sr)).astype(jnp.float32)  # (K,H,S)
    p_full = jnp.transpose(p_all, (1, 0, 2)).reshape(h_out, k * s)

    # Bias packed to match the lane layout of the row-stage result.
    bias_packed = jnp.repeat(jnp.asarray(bias, jnp.float32).reshape(-1), w_out)
    bias_packed = bias_packed.reshape(1, c_out * w_out)

    # x presented as (N, S, C*T): Xmat[a, ci*T+b] = x[n, ci, a, b] (small, pre-upsample tensor).
    x_perm = jnp.transpose(x_nchw, (0, 2, 1, 3)).reshape(n, s, c * t)

    vmem_limit = _vmem_limit_bytes()
    tr = _choose_row_tile(h_out, c_out, w_out, vmem_limit)
    grid = (n, h_out // tr)

    return pl.pallas_call(
        _upsample_conv_kernel,
        out_shape=jax.ShapeDtypeStruct((n, c_out, h_out, w_out), x_nchw.dtype),
        grid_spec=pltpu.PrefetchScalarGridSpec(
            num_scalar_prefetch=0,
            grid=grid,
            in_specs=[
                pl.BlockSpec((1, s, c * t), lambda b, rt: (b, 0, 0)),
                pl.BlockSpec((k, c * t, c_out * w_out), lambda b, rt: (0, 0, 0)),
                pl.BlockSpec((tr, k * s), lambda b, rt: (rt, 0)),
                pl.BlockSpec((1, c_out * w_out), lambda b, rt: (0, 0)),
            ],
            out_specs=pl.BlockSpec((1, c_out, tr, w_out), lambda b, rt: (b, 0, rt, 0)),
        ),
        compiler_params=pltpu.CompilerParams(
            dimension_semantics=("parallel", "parallel"),
            vmem_limit_bytes=vmem_limit,
        ),
    )(x_perm, ehat, p_full, bias_packed)


def _reference_forward(x_nchw, weight_oikk, bias, *, up_dim="both", conv_kernel_size=3):
    """Pure-JAX reference (lax.conv) for correctness checking."""
    sr, sc = _SCALE[up_dim]
    x = jnp.repeat(x_nchw, sr, axis=2) if sr > 1 else x_nchw
    x = jnp.repeat(x, sc, axis=3) if sc > 1 else x
    pad = (conv_kernel_size - 1) // 2
    y = jax.lax.conv_general_dilated(
        x, weight_oikk, window_strides=(1, 1),
        padding=((pad, pad), (pad, pad)),
        dimension_numbers=("NCHW", "OIHW", "NCHW"))
    return y + bias.reshape(1, -1, 1, 1)


if __name__ == "__main__":
    key = jax.random.PRNGKey(0)
    n, c, s, t = 2, 4, 16, 16
    k_x, k_w3, k_b3, k_w5, k_b5 = jax.random.split(key, 5)

    x = jax.random.normal(k_x, (n, c, s, t), dtype=jnp.float32)

    def conv_init(kw_key, kb_key, ksize):
        fan_in = c * ksize * ksize
        bound = 1.0 / float(fan_in) ** 0.5
        w = jax.random.uniform(kw_key, (c, c, ksize, ksize), jnp.float32, -bound, bound)
        b = jax.random.uniform(kb_key, (c,), jnp.float32, -bound, bound)
        return w, b

    w3, b3 = conv_init(k_w3, k_b3, 3)
    w5, b5 = conv_init(k_w5, k_b5, 5)

    cases = [("both", 3, w3, b3), ("temporal", 3, w3, b3),
             ("spatial", 3, w3, b3), ("both", 5, w5, b5)]
    for up_dim, ksize, w, b in cases:
        y = upsample2d_forward(x, w, b, up_dim=up_dim, conv_kernel_size=ksize)
        y = jax.block_until_ready(y)
        y_ref = _reference_forward(x, w, b, up_dim=up_dim, conv_kernel_size=ksize)
        sr, sc = _SCALE[up_dim]
        assert y.shape == (n, c, sr * s, sc * t), (up_dim, ksize, y.shape)
        assert jnp.allclose(y, y_ref, rtol=1e-4, atol=1e-4), (
            "mismatch vs reference", up_dim, ksize,
            float(jnp.max(jnp.abs(y - y_ref))))

    # no-conv path (pure nearest upsample)
    y_nc = jax.block_until_ready(
        upsample2d_forward(x, w3, b3, up_dim="both", with_conv=False))
    assert y_nc.shape == (n, c, 2 * s, 2 * t)

    print("KERNEL_OK")
</pallas_src>

<mosaic_0001>
module attributes {stable_mosaic.version = 11 : i64} {
  func.func @_upsample_conv_kernel(%arg0: i32, %arg1: i32, %arg2: memref<1x16x64xf32, #tpu.memory_space<vmem>>, %arg3: memref<3x64x128xf32, #tpu.memory_space<vmem>>, %arg4: memref<32x48xf32, #tpu.memory_space<vmem>>, %arg5: memref<1x128xf32, #tpu.memory_space<vmem>>, %arg6: memref<1x4x32x32xf32, #tpu.memory_space<vmem>>) attributes {dimension_semantics = [#tpu.dimension_semantics<parallel>, #tpu.dimension_semantics<parallel>], iteration_bounds = array<i64: 2, 1>, scalar_prefetch = 0 : i64, scratch_operands = 0 : i64, tpu.core_type = #tpu.core_type<tc>, window_params = [{transform_indices = @transform_0, window_bounds = array<i64: 1, 16, 64>}, {pipeline_mode = #tpu.pipeline_mode<synchronous>, transform_indices = @transform_1, window_bounds = array<i64: 3, 64, 128>}, {transform_indices = @transform_2, window_bounds = array<i64: 32, 48>}, {pipeline_mode = #tpu.pipeline_mode<synchronous>, transform_indices = @transform_3, window_bounds = array<i64: 1, 128>}, {transform_indices = @transform_4, window_bounds = array<i64: 1, 4, 32, 32>}]} {
    %c0 = arith.constant 0 : index
    %c0_0 = arith.constant 0 : index
    %c0_1 = arith.constant 0 : index
    %0 = vector.load %arg2[%c0, %c0_0, %c0_1] : memref<1x16x64xf32, #tpu.memory_space<vmem>>, vector<1x16x64xf32>
    %1 = vector.shape_cast %0 : vector<1x16x64xf32> to vector<16x64xf32>
    %c0_2 = arith.constant 0 : index
    %c0_3 = arith.constant 0 : index
    %c0_4 = arith.constant 0 : index
    %2 = vector.load %arg3[%c0_2, %c0_3, %c0_4] : memref<3x64x128xf32, #tpu.memory_space<vmem>>, vector<1x64x128xf32>
    %3 = vector.shape_cast %2 : vector<1x64x128xf32> to vector<64x128xf32>
    %cst = arith.constant dense<0.000000e+00> : vector<16x128xf32>
    %4 = tpu.matmul %1, %3, %cst {dimension_numbers = #tpu.dot_dimension_numbers<[1], [0], [0], [1], [0, 0, 1, 1], [], []>} : vector<16x64xf32>, vector<64x128xf32>, vector<16x128xf32> -> vector<16x128xf32>
    %c1 = arith.constant 1 : index
    %c0_5 = arith.constant 0 : index
    %c0_6 = arith.constant 0 : index
    %5 = vector.load %arg3[%c1, %c0_5, %c0_6] : memref<3x64x128xf32, #tpu.memory_space<vmem>>, vector<1x64x128xf32>
    %6 = vector.shape_cast %5 : vector<1x64x128xf32> to vector<64x128xf32>
    %cst_7 = arith.constant dense<0.000000e+00> : vector<16x128xf32>
    %7 = tpu.matmul %1, %6, %cst_7 {dimension_numbers = #tpu.dot_dimension_numbers<[1], [0], [0], [1], [0, 0, 1, 1], [], []>} : vector<16x64xf32>, vector<64x128xf32>, vector<16x128xf32> -> vector<16x128xf32>
    %c2 = arith.constant 2 : index
    %c0_8 = arith.constant 0 : index
    %c0_9 = arith.constant 0 : index
    %8 = vector.load %arg3[%c2, %c0_8, %c0_9] : memref<3x64x128xf32, #tpu.memory_space<vmem>>, vector<1x64x128xf32>
    %9 = vector.shape_cast %8 : vector<1x64x128xf32> to vector<64x128xf32>
    %cst_10 = arith.constant dense<0.000000e+00> : vector<16x128xf32>
    %10 = tpu.matmul %1, %9, %cst_10 {dimension_numbers = #tpu.dot_dimension_numbers<[1], [0], [0], [1], [0, 0, 1, 1], [], []>} : vector<16x64xf32>, vector<64x128xf32>, vector<16x128xf32> -> vector<16x128xf32>
    %11 = tpu.concatenate %4, %7, %10 in 0 : vector<16x128xf32>, vector<16x128xf32>, vector<16x128xf32> -> vector<48x128xf32>
    %c0_11 = arith.constant 0 : index
    %c0_12 = arith.constant 0 : index
    %12 = vector.load %arg4[%c0_11, %c0_12] : memref<32x48xf32, #tpu.memory_space<vmem>>, vector<32x48xf32>
    %cst_13 = arith.constant dense<0.000000e+00> : vector<32x128xf32>
    %13 = tpu.matmul %12, %11, %cst_13 {dimension_numbers = #tpu.dot_dimension_numbers<[1], [0], [0], [1], [0, 0, 1, 1], [], []>} : vector<32x48xf32>, vector<48x128xf32>, vector<32x128xf32> -> vector<32x128xf32>
    %c0_14 = arith.constant 0 : index
    %c0_15 = arith.constant 0 : index
    %14 = vector.load %arg5[%c0_14, %c0_15] : memref<1x128xf32, #tpu.memory_space<vmem>>, vector<1x128xf32>
    %15 = vector.broadcast %14 : vector<1x128xf32> to vector<32x128xf32>
    %16 = arith.addf %13, %15 : vector<32x128xf32>
    %17 = vector.extract_strided_slice %16 {offsets = [0, 0], sizes = [32, 32], strides = [1, 1]} : vector<32x128xf32> to vector<32x32xf32>
    %c0_16 = arith.constant 0 : index
    %c0_17 = arith.constant 0 : index
    %c0_18 = arith.constant 0 : index
    %c0_19 = arith.constant 0 : index
    %18 = vector.load %arg6[%c0_16, %c0_17, %c0_18, %c0_19] : memref<1x4x32x32xf32, #tpu.memory_space<vmem>>, vector<1x1x32x32xf32>
    %19 = vector.shape_cast %18 : vector<1x1x32x32xf32> to vector<32x32xf32>
    %20 = vector.shape_cast %17 : vector<32x32xf32> to vector<1x1x32x32xf32>
    tpu.vector_store %arg6[%c0_16, %c0_17, %c0_18, %c0_19], %20 {strides = array<i32>} : memref<1x4x32x32xf32, #tpu.memory_space<vmem>>, vector<1x1x32x32xf32>,
    %21 = vector.extract_strided_slice %16 {offsets = [0, 32], sizes = [32, 32], strides = [1, 1]} : vector<32x128xf32> to vector<32x32xf32>
    %c0_20 = arith.constant 0 : index
    %c1_21 = arith.constant 1 : index
    %c0_22 = arith.constant 0 : index
    %c0_23 = arith.constant 0 : index
    %22 = vector.load %arg6[%c0_20, %c1_21, %c0_22, %c0_23] : memref<1x4x32x32xf32, #tpu.memory_space<vmem>>, vector<1x1x32x32xf32>
    %23 = vector.shape_cast %22 : vector<1x1x32x32xf32> to vector<32x32xf32>
    %24 = vector.shape_cast %21 : vector<32x32xf32> to vector<1x1x32x32xf32>
    tpu.vector_store %arg6[%c0_20, %c1_21, %c0_22, %c0_23], %24 {strides = array<i32>} : memref<1x4x32x32xf32, #tpu.memory_space<vmem>>, vector<1x1x32x32xf32>,
    %25 = vector.extract_strided_slice %16 {offsets = [0, 64], sizes = [32, 32], strides = [1, 1]} : vector<32x128xf32> to vector<32x32xf32>
    %c0_24 = arith.constant 0 : index
    %c2_25 = arith.constant 2 : index
    %c0_26 = arith.constant 0 : index
    %c0_27 = arith.constant 0 : index
    %26 = vector.load %arg6[%c0_24, %c2_25, %c0_26, %c0_27] : memref<1x4x32x32xf32, #tpu.memory_space<vmem>>, vector<1x1x32x32xf32>
    %27 = vector.shape_cast %26 : vector<1x1x32x32xf32> to vector<32x32xf32>
    %28 = vector.shape_cast %25 : vector<32x32xf32> to vector<1x1x32x32xf32>
    tpu.vector_store %arg6[%c0_24, %c2_25, %c0_26, %c0_27], %28 {strides = array<i32>} : memref<1x4x32x32xf32, #tpu.memory_space<vmem>>, vector<1x1x32x32xf32>,
    %29 = vector.extract_strided_slice %16 {offsets = [0, 96], sizes = [32, 32], strides = [1, 1]} : vector<32x128xf32> to vector<32x32xf32>
    %c0_28 = arith.constant 0 : index
    %c3 = arith.constant 3 : index
    %c0_29 = arith.constant 0 : index
    %c0_30 = arith.constant 0 : index
    %30 = vector.load %arg6[%c0_28, %c3, %c0_29, %c0_30] : memref<1x4x32x32xf32, #tpu.memory_space<vmem>>, vector<1x1x32x32xf32>
    %31 = vector.shape_cast %30 : vector<1x1x32x32xf32> to vector<32x32xf32>
    %32 = vector.shape_cast %29 : vector<32x32xf32> to vector<1x1x32x32xf32>
    tpu.vector_store %arg6[%c0_28, %c3, %c0_29, %c0_30], %32 {strides = array<i32>} : memref<1x4x32x32xf32, #tpu.memory_space<vmem>>, vector<1x1x32x32xf32>,
    return
  }
  func.func @transform_0(%arg0: i32, %arg1: i32) -> (i32, i32, i32) {
    %c0_i32 = arith.constant 0 : i32
    %c0_i32_0 = arith.constant 0 : i32
    %c0_i32_1 = arith.constant 0 : i32
    return %arg0, %c0_i32, %c0_i32_0 : i32, i32, i32
  }
  func.func @transform_1(%arg0: i32, %arg1: i32) -> (i32, i32, i32) {
    %c0_i32 = arith.constant 0 : i32
    %c0_i32_0 = arith.constant 0 : i32
    %c0_i32_1 = arith.constant 0 : i32
    %c0_i32_2 = arith.constant 0 : i32
    return %c0_i32, %c0_i32_0, %c0_i32_1 : i32, i32, i32
  }
  func.func @transform_2(%arg0: i32, %arg1: i32) -> (i32, i32) {
    %c0_i32 = arith.constant 0 : i32
    %c0_i32_0 = arith.constant 0 : i32
    return %arg1, %c0_i32 : i32, i32
  }
  func.func @transform_3(%arg0: i32, %arg1: i32) -> (i32, i32) {
    %c0_i32 = arith.constant 0 : i32
    %c0_i32_0 = arith.constant 0 : i32
    %c0_i32_1 = arith.constant 0 : i32
    return %c0_i32, %c0_i32_0 : i32, i32
  }
  func.func @transform_4(%arg0: i32, %arg1: i32) -> (i32, i32, i32, i32) {
    %c0_i32 = arith.constant 0 : i32
    %c0_i32_0 = arith.constant 0 : i32
    %c0_i32_1 = arith.constant 0 : i32
    return %arg0, %c0_i32, %arg1, %c0_i32_0 : i32, i32, i32, i32
  }
}

</mosaic_0001>

<bundles_post_ra>
// kernel: tpu_custom_call.1
= control target key start
LH: loop header
LB: loop body
LE: loop exit
PB: predicated region body
PF: predicated region fallthrough
CT: control target
= control target key end

     0   :  { %9 = vsyncpa [#allocation3], 0  ;;  %s1520_s0 = inlined_call_operand.hbm [shape: f32[2,16,64], index: 0, kind: input, shape index: {}]   ;;  %s1521_s1 = inlined_call_operand.hbm [shape: f32[3,64,128], index: 1, kind: input, shape index: {}]   ;;  %s1522_s2 = inlined_call_operand.hbm [shape: f32[32,48], index: 2, kind: input, shape index: {}]   ;;  %s1523_s3 = inlined_call_operand.vmem [shape: f32[1,128], index: 3, kind: input, shape index: {}]   ;;  %s1524_s4 = inlined_call_operand.hbm [shape: f32[2,4,32,32], index: 4, kind: output, shape index: {}]  }
   0x1   :  { %11 = vsyncpa [#allocation3 + $0x1], 0 }
   0x2   :  { %12 = vsyncpa [#allocation6], 0 }
   0x3   :  { %13 = vsyncpa [#allocation4], 0 }
   0x4   :  { %15 = vsyncpa [#allocation4 + $0x1], 0  ;;  %s1270_s15 = smov 0   ;;  %s1272_s16 = smov 0  }
   0x5   :  { %s1274_s17 = smov 0   ;;  %s1276_s18 = smov 0  }
   0x6   :  { %s1278_s19 = smov 0   ;;  %s1280_s20 = smov 0  }
   0x7 LB: > { %s819_s21 = sadd.s32 4294967295, %s1232_s20   ;;  %s820_s22 = sadd.s32 4294967294, %s1232_s20   ;;  %s1232_s20 = sphi %s1280_s20, %s21_s20   ;;  %s1228_s19 = sphi %s1278_s19, %s1543_s19   ;;  %s1224_s18 = sphi %s1276_s18, %s1542_s18   ;;  %s1220_s17 = sphi %s1274_s17, %s1541_s17   ;;  %s1216_s16 = sphi %s1272_s16, %s1540_s16   ;;  %s1212_s15 = sphi %s1270_s15, %s1539_s15  }
   0x8   : > { %p53_p0 = scmp.ne.s32.totalorder %s1216_s16, %s1212_s15  ;;  %p1304_p1 = scmp.eq.s32.totalorder %s819_s21, 0 }
   0x9   : > { %p1308_p2 = scmp.eq.s32.totalorder %s819_s21, 1  ;;  %p153_p3 = scmp.eq.s32.totalorder %s820_s22, 1 }
   0xa   : > { %p1314_p4 = por %p1304_p1, %p53_p0  ;;  %p821_p5 = scmp.ge.s32.totalorder %s1232_s20, 1 }
   0xb   : > { %p1319_p6 = por %p153_p3, %p53_p0  ;;  %p160_p7 = scmp.lt.s32.totalorder %s1232_s20, 3 }
   0xc   : > { %s1234_s28 = smov [#allocation5]   ;;  %s1235_s5 = smov [#allocation7]  }
   0xd   : > { %s1530_s26 = scalar_select %p1319_p6, 1, 0 }
   0xe   : > { %p1324_p8 = pnand %p821_p5, %p160_p7  ;;  %s172_s29 = sshll.u32 %s1234_s28, 4  ;;  %s173_s29 = int_to_ptr.vmem [resolvable:$true] %s172_s29 }
   0xf   : > { %s188_s6 = sshll.u32 %s1235_s5, 4  ;;  %s1079_s7 = scalar_lea.vmem %s173_s29, 3072  ;;  %s189_s6 = int_to_ptr.vmem [resolvable:$true] %s188_s6 }
  0x10   : > { %p990_p9 = pneg %p1324_p8  ;;  %p1080_p13 = scmp.ne.s32.totalorder %s173_s29, %s1079_s7 }
  0x11   : > { %p1087_p5 = scmp.lt.s32.totalorder %s173_s29, %s173_s29  ;;  %p1088_p7 = scmp.lt.s32.totalorder %s1079_s7, %s1079_s7 }
  0x12   : > { %p1333_p11 = pnand %p990_p9, %p1304_p1 }
  0x13   : > { %p1089_p10 = por %p1088_p7, %p1087_p5 }
  0x14   : > { %p1070_p12 = pneg %p1333_p11 }
  0x16   : > { %p1082_p0 = pnand %p1080_p13, %p1070_p12 }
  0x18   : > { %p1083_p3 = pneg %p1082_p0 }
  0x1a   : > { %p1090_p9 = pnand %p1089_p10, %p1083_p3 }
  0x1c   : > { %1093 = shalt.err (!%p1090_p9)
}
  0x1d   : > { %s1525_s8 = smov 128   ;;  %s1526_s9 = smov 8  }
  0x1e   : > { %993 = dma.hbm_to_vmem [thread:$0]  (!%p1333_p11), %s1521_s1, 3072, %s173_s29, [#allocation6], %s1525_s8, %s1525_s8, %s1526_s9  }
  0x1f   : > { %s1105_s12 = scalar_lea.vmem %s189_s6, 512  ;;  %p1113_p10 = scmp.lt.s32.totalorder %s189_s6, %s189_s6 }
  0x20   : > { %p1106_p13 = scmp.ne.s32.totalorder %s189_s6, %s1105_s12  ;;  %p1114_p3 = scmp.lt.s32.totalorder %s1105_s12, %s1105_s12 }
  0x22   : > { %p1108_p0 = pnand %p1106_p13, %p1070_p12  ;;  %p1115_p7 = por %p1114_p3, %p1113_p10 }
  0x24   : > { %p1109_p5 = pneg %p1108_p0 }
  0x26   : > { %p1116_p9 = pnand %p1115_p7, %p1109_p5 }
  0x28   : > { %1119 = shalt.err (!%p1116_p9)
}
  0x29   : > { %996 = dma.hbm_to_vmem [thread:$0]  (!%p1333_p11), %s1522_s2, 512, %s189_s6, [#allocation6], %s1525_s8, %s1525_s8, %s1526_s9  }
  0x2a   : > { %s33_s21 = sadd.s32 1, %s1228_s19  ;;  %s40_s22 = sadd.s32 1, %s1220_s17 }
  0x2b   : > { %p35_p12 = scmp.ge.s32.totalorder %s33_s21, 2  ;;  %p47_p13 = scmp.ne.s32.totalorder %s1220_s17, %s1216_s16 }
  0x2c   : > { %p48_p0 = scmp.eq.s32.totalorder %s1232_s20, 0  ;;  %p1007_p5 = scmp.lt.s32.totalorder %s1232_s20, 2 }
  0x2d   : > { %s1545_s21 = smov (%p35_p12, %s33_s21), 0  ;;  %p1371_p3 = por %p1308_p2, %p47_p13 }
  0x2e   : > { %p49_p10 = por %p48_p0, %p47_p13  ;;  %s37_s29 = ssub.s32 %s1228_s19, %s1545_s21 }
  0x2f   : > { %s205_s30 = sand.u32 1, %s1220_s17   ;;  %p38_p7 = scmp.eq.s32.totalorder %s37_s29, 0 }
  0x30   : > { %s825_s5 = sshll.u32 %s205_s30, 4  ;;  %s861_s6 = sshll.u32 %s1228_s19, 8 }
  0x31   : > { %s1380_s7 = scalar_select %p38_p7, %s1220_s17, %s40_s22  }
  0x32   : > { %s215_s12 = scalar_lea.hbm %s1520_s0, %s861_s6  ;;  %s209_s13 = scalar_lea.vmem [#allocation2], %s825_s5 }
  0x33   : > { %s216_s14 = sshll.u32 %s209_s13, 4  ;;  %p1387_p11 = pnand %p1007_p5, %p49_p10  ;;  %s217_s14 = int_to_ptr.vmem [resolvable:$true] %s216_s14 }
  0x34   : > { %s206_s8 = scalar_lea.sflag [#allocation3], %s205_s30  ;;  %s1133_s29 = scalar_lea.vmem %s217_s14, 256 }
  0x35   : > { %p1122_p2 = pneg %p1387_p11  ;;  %p1134_p9 = scmp.ne.s32.totalorder %s217_s14, %s1133_s29 }
  0x36   : > { %s1238_s22 = smov [#allocation2]  }
  0x37   : > { %p1136_p12 = pnand %p1134_p9, %p1122_p2  ;;  %s1138_s9 = sshll.u32 %s1238_s22, 4  ;;  %s1139_s9 = int_to_ptr.vmem [resolvable:$false] %s1138_s9 }
  0x38   : > { %s1140_s6 = scalar_lea.vmem %s1139_s9, 512  ;;  %p1141_p0 = scmp.lt.s32.totalorder %s217_s14, %s1139_s9 }
  0x39   : > { %p1137_p13 = pneg %p1136_p12  ;;  %p1142_p7 = scmp.lt.s32.totalorder %s1140_s6, %s1133_s29 }
  0x3b   : > { %p1143_p6 = por %p1142_p7, %p1141_p0 }
  0x3d   : > { %p1144_p5 = pnand %p1143_p6, %p1137_p13 }
  0x3f   : > { %1147 = shalt.err (!%p1144_p5)
}
  0x40   : > { %s1535_s5 = smov 8   ;;  %s1536_s10 = smov 128  }
  0x41   : > { %1000 = dma.hbm_to_vmem [thread:$0]  (!%p1387_p11), %s215_s12, 256, %s217_s14, %s206_s8, %s1536_s10, %s1536_s10, %s1535_s5  }
  0x42   : > { %228 = sbr.rel (%p1324_p8) target bundleno = 656 (0x290), region = 36  ;;  %s1401_s30 = sand.u32 (!%p1324_p8), 1, %s1216_s16  }
  0x43   : > { %s829_s9 = sshll.u32 (!%p1324_p8), %s1401_s30, 4  ;;  %s231_s11 = scalar_lea.sflag (!%p1324_p8), [#allocation3], %s1401_s30 }
  0x44   : > { %s1405_s13 = scalar_lea.vmem (!%p1324_p8), [#allocation2], %s829_s9 }
  0x47   : > { %1199 = dma.done.wait (%p1314_p4), %s231_s11, 256  }
  0x48   : > { %1201 = vsyncadd (%p1314_p4), %s231_s11, 4294967040 }
  0x49   : > { %1203 = dma.done.wait (%p1304_p1), [#allocation6], 3584  }
  0x4a   : > { %1205 = vsyncadd (%p1304_p1), [#allocation6], 4294963712  ;;  %v278_v0 = vld [vmem:[#allocation5 + $0x38] sm:$0xff]  ;;  %v277_v1 = vld [vmem:[#allocation5 + $0x30] sm:$0xff]  ;;  %vm279_vm0 = vcmask 523264   ;;  %vm540_vm1 = vcmask 392192  }
  0x4b   : > { %903 = vmatprep.subr.mxu0 %v278_v0  ;;  %v276_v2 = vld [vmem:[#allocation5 + $0x28] sm:$0xff]  ;;  %v269_v3 = vld [vmem:[%s1405_s13] sm:$0xff]  ;;  %v369_v4 = vld [vmem:[#allocation5 + $0x78] sm:$0xff]  ;;  %s832_s23 = sshll.u32 %s1401_s30, 7  ;;  %vm638_vm2 = vcmask 261120   ;;  %s1239_s12 = smov 64  }
  0x4c   : > { %904 = vmatpush3.msra.mxu0 %v278_v0  ;;  %919 = vmatprep.mubr.msk.f32.mxu0 %vm279_vm0, %v269_v3  ;;  %v275_v5 = vld [vmem:[#allocation5 + $0x20] sm:$0xff]  ;;  %v368_v6 = vld [vmem:[#allocation5 + $0x70] sm:$0xff]  ;;  %v367_v7 = vld [vmem:[#allocation5 + $0x68] sm:$0xff]  ;;  %s1431_s8 = scalar_lea.vmem [#allocation8], %s832_s23  ;;  %s1240_s14 = smov 96  }
  0x4d   : > { %905 = vmatprep.subr.mxu0 %v277_v1  ;;  %922 = vmatprep.subr.mxu1 %v369_v4  ;;  %v274_v8 = vld [vmem:[#allocation5 + $0x18] sm:$0xff]  ;;  %v366_v9 = vld [vmem:[#allocation5 + $0x60] sm:$0xff]  ;;  %v273_v10 = vld [vmem:[#allocation5 + $0x10] sm:$0xff]  ;;  %s1241_s24 = smov 32   ;;  %s862_s29 = sshll.u32 %s1224_s18, 11 }
  0x4e   : > { %906 = vmatpush3.msra.mxu0 %v277_v1  ;;  %923 = vmatpush3.msra.mxu1 %v369_v4  ;;  %v365_v11 = vld [vmem:[#allocation5 + $0x58] sm:$0xff]  ;;  %v272_v12 = vld [vmem:[#allocation5 + $0x8] sm:$0xff]  ;;  %v364_v13 = vld [vmem:[#allocation5 + $0x50] sm:$0xff]  ;;  %s714_s22 = sshll.u32 %s1431_s8, 4  ;;  %s1466_s10 = scalar_lea.hbm %s1524_s4, %s862_s29  ;;  %s1468_s22 = int_to_ptr.vmem [resolvable:$true] %s714_s22 }
  0x4f   : > { %907 = vmatprep.subr.mxu0 %v276_v2  ;;  %924 = vmatprep.subr.mxu1 %v368_v6  ;;  %v271_v14 = vld [vmem:[#allocation5] sm:$0xff]  ;;  %v363_v15 = vld [vmem:[#allocation5 + $0x48] sm:$0xff]  ;;  %v453_v17 = vld [vmem:[#allocation5 + $0xb8] sm:$0xff]  ;;  %s699_s18 = scalar_lea.sflag [#allocation4], %s1401_s30  ;;  %s1148_s9 = scalar_lea.vmem %s1468_s22, 2048 }
  0x50   : > { %908 = vmatpush3.msra.mxu0 %v276_v2  ;;  %925 = vmatpush3.msra.mxu1 %v368_v6  ;;  %v270_v16 = vld [vmem:[%s1405_s13 + $0x8] sm:$0xff]  ;;  %v452_v18 = vld [vmem:[#allocation5 + $0xb0] sm:$0xff]  ;;  %v362_v19 = vld [vmem:[#allocation5 + $0x40] sm:$0xff]  ;;  %p1149_p1 = scmp.ne.s32.totalorder %s1468_s22, %s1148_s9  ;;  %s1242_s11 = smov [#allocation8]  }
  0x51   : > { %909 = vmatprep.subr.mxu0 %v275_v5  ;;  %926 = vmatprep.subr.mxu1 %v367_v7  ;;  %v451_v20 = vld [vmem:[#allocation5 + $0xa8] sm:$0xff]  ;;  %v450_v21 = vld [vmem:[#allocation5 + $0xa0] sm:$0xff]  ;;  %v449_v22 = vld [vmem:[#allocation5 + $0x98] sm:$0xff]  ;;  %s1152_s13 = sshll.u32 %s1242_s11, 4  ;;  %s1153_s13 = int_to_ptr.vmem [resolvable:$false] %s1152_s13 }
  0x52   : > { %910 = vmatpush3.msra.mxu0 %v275_v5  ;;  %927 = vmatpush3.msra.mxu1 %v367_v7  ;;  %v448_v23 = vld [vmem:[#allocation5 + $0x90] sm:$0xff]  ;;  %v447_v24 = vld [vmem:[#allocation5 + $0x88] sm:$0xff]  ;;  %v446_v25 = vld [vmem:[#allocation5 + $0x80] sm:$0xff]  ;;  %p1150_p4 = pnand %p1149_p1, %p1371_p3  ;;  %s1154_s23 = scalar_lea.vmem %s1153_s13, 4096 }
  0x53   : > { %911 = vmatprep.subr.mxu0 %v274_v8  ;;  %928 = vmatprep.subr.mxu1 %v366_v9  ;;  %v529_v26 = vld [vmem:[#allocation7] sm:$0xff]  ;;  %v530_v33 = vld [vmem:[#allocation7 + $0x8] sm:$0xff]  ;;  %v531_v34 = vld [vmem:[#allocation7 + $0x10] sm:$0xff]  ;;  %p1155_p8 = scmp.lt.s32.totalorder %s1468_s22, %s1153_s13  ;;  %p1156_p10 = scmp.lt.s32.totalorder %s1154_s23, %s1148_s9 }
  0x54   : > { %912 = vmatpush3.msra.mxu0 %v274_v8  ;;  %929 = vmatpush3.msra.mxu1 %v366_v9  ;;  %v532_v35 = vld [vmem:[#allocation7 + $0x18] sm:$0xff]  ;;  %v839_v36 = vld [vmem:[%s1523_s3] ss:$0 sm:$0xff]  ;;  %p1151_p6 = pneg %p1150_p4 }
  0x55   : > { %913 = vmatprep.subr.mxu0 %v273_v10  ;;  %930 = vmatprep.subr.mxu1 %v365_v11  ;;  %p1157_p11 = por %p1156_p10, %p1155_p8 }
  0x56   : > { %914 = vmatpush3.msra.mxu0 %v273_v10  ;;  %931 = vmatpush3.msra.mxu1 %v365_v11 }
  0x57   : > { %915 = vmatprep.subr.mxu0 %v272_v12  ;;  %932 = vmatprep.subr.mxu1 %v364_v13  ;;  %p1158_p2 = pnand %p1157_p11, %p1151_p6 }
  0x58   : > { %916 = vmatpush3.msra.mxu0 %v272_v12  ;;  %933 = vmatpush3.msra.mxu1 %v364_v13 }
  0x59   : > { %917 = vmatprep.subr.mxu0 %v271_v14  ;;  %934 = vmatprep.subr.mxu1 %v363_v15 }
  0x5a   : > { %918 = vmatpush3.msra.mxu0 %v271_v14  ;;  %935 = vmatpush3.msra.mxu1 %v363_v15 }
  0x5b   : > { %920 = vmatmul.mubr.msk.f32.vlgmr.msra.gmra.mxu0 %vm279_vm0, %v270_v16  ;;  %941 = vmatprep.subr.mxu0 %v453_v17 }
  0x5c   : > { %942 = vmatpush3.msra.mxu0 %v453_v17  ;;  %957 = vmatprep.mubr.msk.f32.mxu0 %vm279_vm0, %v269_v3 }
  0x5d   : > { %943 = vmatprep.subr.mxu0 %v452_v18  ;;  %936 = vmatprep.subr.mxu1 %v362_v19 }
  0x5e   : > { %944 = vmatpush3.msra.mxu0 %v452_v18  ;;  %937 = vmatpush3.msra.mxu1 %v362_v19 }
  0x5f   : > { %945 = vmatprep.subr.mxu0 %v451_v20  ;;  %938 = vmatprep.mubr.msk.f32.mxu1 %vm279_vm0, %v269_v3 }
  0x60   : > { %946 = vmatpush3.msra.mxu0 %v451_v20  ;;  %939 = vmatmul.mubr.msk.f32.vlgmr.msra.gmra.mxu1 %vm279_vm0, %v270_v16 }
  0x61   : > { %947 = vmatprep.subr.mxu0 %v450_v21  ;;  %972 = vmatprep.mubr.msk.f32.mxu1 %vm540_vm1, %v529_v26 }
  0x62   : > { %948 = vmatpush3.msra.mxu0 %v450_v21 }
  0x63   : > { %949 = vmatprep.subr.mxu0 %v449_v22 }
  0x64   : > { %950 = vmatpush3.msra.mxu0 %v449_v22 }
  0x65   : > { %951 = vmatprep.subr.mxu0 %v448_v23 }
  0x66   : > { %952 = vmatpush3.msra.mxu0 %v448_v23 }
  0x67   : > { %953 = vmatprep.subr.mxu0 %v447_v24 }
  0x68   : > { %954 = vmatpush3.msra.mxu0 %v447_v24 }
  0x69   : > { %955 = vmatprep.subr.mxu0 %v446_v25 }
  0x6a   : > { %956 = vmatpush3.msra.mxu0 %v446_v25 }
  0x6b   : > { %958 = vmatmul.mubr.msk.f32.vlgmr.msra.gmra.mxu0 %vm279_vm0, %v270_v16 }
 0x11b   : > { %v921_v27 = vpop.f32.mrf.mxu0 }
 0x11d   : > { %v352_v28 = vpop.f32.mrf.mxu0 }
 0x120   : > { %v940_v30 = vpop.f32.mrf.mxu1 }
 0x122   : > { %v436_v32 = vpop.f32.mrf.mxu1 }
 0x12b   : > { %v959_v29 = vpop.f32.mrf.mxu0 }
 0x12c   : > { %960 = vmatprep.subr.mxu1 %v959_v29 }
 0x12d   : > { %v520_v31 = vpop.f32.mrf.mxu0  ;;  %961 = vmatpush3.msra.mxu1 %v959_v29 }
 0x12e   : > { %962 = vmatprep.subr.mxu1 %v520_v31 }
 0x12f   : > { %963 = vmatpush3.msra.mxu1 %v520_v31 }
 0x130   : > { %964 = vmatprep.subr.mxu1 %v940_v30 }
 0x131   : > { %965 = vmatpush3.msra.mxu1 %v940_v30 }
 0x132   : > { %966 = vmatprep.subr.mxu1 %v436_v32 }
 0x133   : > { %967 = vmatpush3.msra.mxu1 %v436_v32 }
 0x134   : > { %968 = vmatprep.subr.mxu1 %v921_v27 }
 0x135   : > { %969 = vmatpush3.msra.mxu1 %v921_v27 }
 0x136   : > { %970 = vmatprep.subr.mxu1 %v352_v28 }
 0x137   : > { %971 = vmatpush3.msra.mxu1 %v352_v28 }
 0x138   : > { %973 = vmatmul.mubr.msk.f32.vlgmr.msra.gmra.mxu1 %vm540_vm1, %v530_v33 }
 0x139   : > { %975 = vmatprep.mubr.msk.f32.mxu1 %vm540_vm1, %v531_v34 }
 0x13c   : > { %976 = vmatmul.mubr.msk.f32.gmra.mxu1 %vm540_vm1, %v532_v35 }
 0x1f8   : > { %v974_v37 = vpop.f32.mrf.mxu1 }
 0x1f9   : > { %v625_v38 = vadd.f32 %v974_v37, %v839_v36 }
 0x1fa   : > { %v619_v39 = vpop.f32.mrf.mxu1 }
 0x1fb   : > { %640 = vst.msk [vmem:[%s1431_s8 + $0x8] sm:$0xff] %vm638_vm2, %v625_v38  ;;  %v620_v40 = vadd.f32 %v839_v36, %v619_v39  ;;  %666 = vrot.lane.b32.xlu1 %v625_v38, %s1239_s12  ;;  %649 = vrot.lane.b32.xlu0 %v625_v38, %s1240_s14 }
 0x1fc   : > { %v977_v41 = vpop.f32.mrf.mxu1 }
 0x1fd   : > { %639 = vst.msk [vmem:[%s1431_s8] sm:$0xff] %vm638_vm2, %v620_v40  ;;  %v635_v42 = vadd.f32 %v977_v41, %v839_v36 }
 0x1fe   : > { %v629_v43 = vpop.f32.mrf.mxu1 }
 0x1ff   : > { %642 = vst.msk [vmem:[%s1431_s8 + $0x18] sm:$0xff] %vm638_vm2, %v635_v42  ;;  %683 = vrot.lane.b32.xlu1 %v625_v38, %s1241_s24  ;;  %647 = vrot.lane.b32.xlu0 %v620_v40, %s1240_s14  ;;  %v630_v44 = vadd.f32 %v839_v36, %v629_v43 }
 0x201   : > { %641 = vst.msk [vmem:[%s1431_s8 + $0x10] sm:$0xff] %vm638_vm2, %v630_v44 }
 0x203   : > { %653 = vrot.lane.b32.xlu1 %v635_v42, %s1240_s14  ;;  %664 = vrot.lane.b32.xlu0 %v620_v40, %s1239_s12 }
 0x207   : > { %670 = vrot.lane.b32.xlu1 %v635_v42, %s1239_s12  ;;  %681 = vrot.lane.b32.xlu0 %v620_v40, %s1241_s24 }
 0x20b   : > { %651 = vrot.lane.b32.xlu1 %v630_v44, %s1240_s14  ;;  %668 = vrot.lane.b32.xlu0 %v630_v44, %s1239_s12 }
 0x20f   : > { %687 = vrot.lane.b32.xlu1 %v635_v42, %s1241_s24  ;;  %685 = vrot.lane.b32.xlu0 %v630_v44, %s1241_s24 }
 0x26d   : > { %v667_v45 = vpop.permute.xlu1 %666  ;;  %v650_v46 = vpop.permute.xlu0 %649 }
 0x26e   : > { %849 = vst.msk [vmem:[%s1431_s8 + $0x48] sm:$0xff] %vm638_vm2, %v667_v45  ;;  %845 = vst.msk [vmem:[%s1431_s8 + $0x28] sm:$0xff] %vm638_vm2, %v650_v46 }
 0x271   : > { %v684_v47 = vpop.permute.xlu1 %683  ;;  %v648_v48 = vpop.permute.xlu0 %647 }
 0x272   : > { %853 = vst.msk [vmem:[%s1431_s8 + $0x68] sm:$0xff] %vm638_vm2, %v684_v47  ;;  %844 = vst.msk [vmem:[%s1431_s8 + $0x20] sm:$0xff] %vm638_vm2, %v648_v48 }
 0x275   : > { %v654_v49 = vpop.permute.xlu1 %653  ;;  %v665_v50 = vpop.permute.xlu0 %664 }
 0x276   : > { %847 = vst.msk [vmem:[%s1431_s8 + $0x38] sm:$0xff] %vm638_vm2, %v654_v49  ;;  %848 = vst.msk [vmem:[%s1431_s8 + $0x40] sm:$0xff] %vm638_vm2, %v665_v50 }
 0x279   : > { %v671_v51 = vpop.permute.xlu1 %670  ;;  %v682_v52 = vpop.permute.xlu0 %681 }
 0x27a   : > { %851 = vst.msk [vmem:[%s1431_s8 + $0x58] sm:$0xff] %vm638_vm2, %v671_v51  ;;  %852 = vst.msk [vmem:[%s1431_s8 + $0x60] sm:$0xff] %vm638_vm2, %v682_v52 }
 0x27d   : > { %v652_v53 = vpop.permute.xlu1 %651  ;;  %v669_v54 = vpop.permute.xlu0 %668 }
 0x27e   : > { %846 = vst.msk [vmem:[%s1431_s8 + $0x30] sm:$0xff] %vm638_vm2, %v652_v53  ;;  %850 = vst.msk [vmem:[%s1431_s8 + $0x50] sm:$0xff] %vm638_vm2, %v669_v54 }
 0x281   : > { %v688_v55 = vpop.permute.xlu1 %687  ;;  %v686_v56 = vpop.permute.xlu0 %685 }
 0x282   : > { %855 = vst.msk [vmem:[%s1431_s8 + $0x78] sm:$0xff] %vm638_vm2, %v688_v55  ;;  %854 = vst.msk [vmem:[%s1431_s8 + $0x70] sm:$0xff] %vm638_vm2, %v686_v56 }
 0x283   : > { %1161 = shalt.err (!%p1158_p2)
}
 0x284   : > { %s1162_s25 = scalar_lea.hbm %s1466_s10, 2048  ;;  %s1166_s12 = scalar_lea.hbm %s1524_s4, 4096 }
 0x285   : > { %p1163_p9 = scmp.ne.s32.totalorder %s1466_s10, %s1162_s25  ;;  %p1167_p0 = scmp.lt.s32.totalorder %s1466_s10, %s1524_s4 }
 0x286   : > { %p1168_p7 = scmp.lt.s32.totalorder %s1166_s12, %s1162_s25 }
 0x287   : > { %p1164_p12 = pnand %p1163_p9, %p1371_p3 }
 0x288   : > { %p1169_p5 = por %p1168_p7, %p1167_p0 }
 0x289   : > { %p1165_p13 = pneg %p1164_p12 }
 0x28b   : > { %p1170_p1 = pnand %p1169_p5, %p1165_p13 }
 0x28d   : > { %1173 = shalt.err (!%p1170_p1)
}
 0x28e   : > { %s1243_s29 = smov 128   ;;  %s1244_s6 = smov 8  }
 0x28f   : > { %988 = dma.vmem_to_hbm [thread:$0]  (%p1371_p3), %s1468_s22, 2048, %s1466_s10, %s699_s18, %s1243_s29, %s1243_s29, %s1244_s6  }
 0x290 PF: > { %s729_s5 = sand.u32 1, %s1212_s15   ;;  %p1537_p4 = scmp.ne.s32.totalorder %s1530_s26, 0 }
 0x291   : > { %p1538_p6 = scmp.ge.s32.totalorder %s1232_s20, 2  ;;  %s730_s9 = scalar_lea.sflag [#allocation4], %s729_s5 }
 0x293   : > { %p1002_p8 = pnand %p1538_p6, %p1537_p4 }
 0x295   : > { %p1003_p10 = pneg %p1002_p8 }
 0x297   : > { %1207 = dma.done.wait (%p1003_p10), %s730_s9, 2048  }
 0x298   : > { %1209 = vsyncadd (%p1003_p10), %s730_s9, 4294965248  ;;  %s21_s20 = sadd.s32 1, %s1232_s20   ;;  %s1539_s15 = smov %s1216_s16 }
 0x299   : > { %p18_p11 = scmp.ge.s32.totalorder %s21_s20, 4   ;;  %s1540_s16 = smov %s1220_s17 }
 0x29a   : > { %s1541_s17 = smov %s1380_s7  ;;  %s1542_s18 = smov %s1228_s19 }
 0x29b   : > { %s1543_s19 = smov %s1545_s21  ;;  %20 = sbr.rel (!%p18_p11) target bundleno = 7 (0x7), region = 95 }
 0x2a0   :  { %735 = vsyncpa [#allocation3], 1 }
 0x2a1   :  { %737 = vsyncpa [#allocation3 + $0x1], 1 }
 0x2a2   :  { %738 = vsyncpa [#allocation6], 1 }
 0x2a3   :  { %739 = vsyncpa [#allocation4], 1 }
 0x2a4   :  { %741 = vsyncpa [#allocation4 + $0x1], 1 }

</bundles_post_ra>
